<compile_context>
chip_gen: v6e
topology: v6e:2x2x1
jax: 0.10.0
libtpu: 0.0.40
codegen_flags: <defaults>
</compile_context>

<pallas_src>
import jax
import jax.numpy as jnp
import numpy as np
from jax.experimental import pallas as pl
from jax.experimental.pallas import tpu as pltpu  # noqa: F401  (kept for parity)

EPS = 1e-5  # PyTorch LayerNorm default


def _layer_norm(x, gamma, beta):
    # Single-pass: both reductions issue independently (perf-review item).
    d = x.shape[-1]
    s1 = jnp.sum(x, axis=-1, keepdims=True)
    s2 = jnp.sum(x * x, axis=-1, keepdims=True)
    mu = s1 * (1.0 / d)
    var = s2 * (1.0 / d) - mu * mu
    return (x - mu) * jax.lax.rsqrt(var + EPS) * gamma + beta


def _layer_norm_ref(x, gamma, beta):
    # Two-pass form, used only by the pure-JAX reference.
    mu = jnp.mean(x, axis=-1, keepdims=True)
    var = jnp.mean((x - mu) ** 2, axis=-1, keepdims=True)
    return (x - mu) * jax.lax.rsqrt(var + EPS) * gamma + beta


def _gelu_exact(x):
    # nn.GELU() default: exact erf form.
    return 0.5 * x * (1.0 + jax.lax.erf(x * (1.0 / np.sqrt(2.0))))


# ----------------------------- Pallas kernel --------------------------------

def gmlp_fused_kernel(ids_ref, wte_ref, small_ref, wi_ref, wc_ref, bc_ref,
                      wo_ref, wlm_ref, out_ref):
    """Full gMLP forward (embedding + all blocks + head), batch-flattened.

    ids_ref:   (M, 1)   int32 token ids, M = B*T
    wte_ref:   (V, D)   bf16 embedding table
    small_ref: (R, 128) f32  packed small params:
                 per block i (base = 6*i): ln_g, ln_b, bi, sln_g, sln_b, bo
                 rows 6*N, 6*N+1: final-LN gamma, beta
    wi_ref:    (N, D, H) bf16  proj_in
    wc_ref:    (N, M, M) bf16  block-diagonal fc_causal token-mix weight
    bc_ref:    (N, M, H) f32   fc_causal bias, pre-broadcast lane-dense
    wo_ref:    (N, H, D) bf16  proj_out
    wlm_ref:   (D, V)    bf16  lm_head (no bias)
    out_ref:   (M, V)    f32   logits (lane-dense, V = 128)
    """
    M, V = out_ref.shape
    D = wte_ref.shape[1]
    H = wi_ref.shape[2]
    n_blocks = wi_ref.shape[0]

    def row(r, w):                       # static slice from the packed buffer
        return small_ref[r:r + 1, 0:w]   # (1, w) f32

    # ---- embedding lookup fused as a one-hot MXU matmul ----------------
    iota_v = jax.lax.broadcasted_iota(jnp.int32, (M, V), 1)
    one_hot = jnp.where(iota_v == ids_ref[...], 1.0, 0.0).astype(jnp.bfloat16)
    x = jnp.dot(one_hot, wte_ref[...],
                preferred_element_type=jnp.float32)              # (M, D) f32
    # (embedding dropout is identity in eval)

    # ---- gMLP blocks (N small -> unrolled; switch to fori_loop if N grows) --
    for i in range(n_blocks):
        base = 6 * i
        ln_g, ln_b = row(base + 0, D), row(base + 1, D)
        bi = row(base + 2, H)
        sln_g, sln_b = row(base + 3, H), row(base + 4, H)
        bo = row(base + 5, D)

        h = _layer_norm(x, ln_g, ln_b)                           # pre-LN
        u = _gelu_exact(jnp.dot(h.astype(jnp.bfloat16), wi_ref[i],
                                preferred_element_type=jnp.float32) + bi)
        # SpatialGatingUnit: LN over channels, token mixing over T
        # (block-diagonal over the flattened B*T axis).
        z = _layer_norm(u, sln_g, sln_b)                         # (M, H)
        v = jnp.dot(wc_ref[i], z.astype(jnp.bfloat16),
                    preferred_element_type=jnp.float32) + bc_ref[i]
        g = v * u                                                # gating
        x = x + jnp.dot(g.astype(jnp.bfloat16), wo_ref[i],
                        preferred_element_type=jnp.float32) + bo

    # ---- final LayerNorm + lm_head --------------------------------------
    fbase = 6 * n_blocks
    h = _layer_norm(x, row(fbase + 0, D), row(fbase + 1, D))
    out_ref[...] = jnp.dot(h.astype(jnp.bfloat16), wlm_ref[...],
                           preferred_element_type=jnp.float32)


# ------------------------------- wrappers ------------------------------------

def prep_params(block_params, fln_g, fln_b, wte, wlm, B, T):
    """One-time parameter repack (outside the hot path):
       * coalesce every sub-KB parameter into one (R, 128) f32 buffer,
       * cast MXU weights to bf16,
       * bake the batch-flattened block-diagonal token-mix weight,
       * pre-broadcast the fc_causal bias to a lane-dense (B*T, H) tile."""
    H = block_params[0][2].shape[1]
    eye_b = jnp.eye(B, dtype=jnp.float32)

    def pad128(v):
        v = jnp.asarray(v, jnp.float32).reshape(-1)
        return jnp.pad(v, (0, 128 - v.shape[0]))

    rows = []
    for (ln_g, ln_b, _wi, bi, sln_g, sln_b, _wc, _bc, _wo, bo) in block_params:
        rows += [pad128(ln_g), pad128(ln_b), pad128(bi),
                 pad128(sln_g), pad128(sln_b), pad128(bo)]
    rows += [pad128(fln_g), pad128(fln_b)]
    while len(rows) % 8 != 0:                      # sublane-align the buffer
        rows.append(jnp.zeros((128,), jnp.float32))
    small = jnp.stack(rows)                                            # (R,128)

    wi = jnp.stack([p[2] for p in block_params]).astype(jnp.bfloat16)  # (N,D,H)
    wc_bd = jnp.stack([jnp.kron(eye_b, p[6]) for p in block_params]
                      ).astype(jnp.bfloat16)                           # (N,BT,BT)
    bc_bt = jnp.stack([jnp.tile(jnp.broadcast_to(p[7], (T, H)), (B, 1))
                       for p in block_params]).astype(jnp.float32)     # (N,BT,H)
    wo = jnp.stack([p[8] for p in block_params]).astype(jnp.bfloat16)  # (N,H,D)
    wte_b = wte.astype(jnp.bfloat16)                                   # (V,D)
    wlm_b = wlm.astype(jnp.bfloat16)                                   # (D,V)
    return (wte_b, small, wi, wc_bd, bc_bt, wo, wlm_b)


def gmlp_forward(ids, prepped):
    wte_b, small, wi, wc_bd, bc_bt, wo, wlm_b = prepped
    B, T = ids.shape
    M = B * T
    V, D = wte_b.shape
    H = wi.shape[2]
    n_blocks = wi.shape[0]

    ids_col = ids.reshape(M, 1).astype(jnp.int32)
    args = (ids_col, wte_b, small, wi, wc_bd, bc_bt, wo, wlm_b)

    flops = (2 * M * V * D                                   # one-hot embedding
             + n_blocks * (2 * M * D * H + 2 * M * M * H + 2 * M * H * D)
             + 2 * M * D * V)                                # lm_head
    trans = n_blocks * M * H + (2 * n_blocks + 1) * M        # erf + rsqrt (approx)
    bytes_accessed = sum(int(np.prod(a.shape)) * a.dtype.itemsize for a in args) \
        + M * V * 4
    cost = pl.CostEstimate(flops=int(flops), transcendentals=int(trans),
                           bytes_accessed=int(bytes_accessed))

    # No grid + no BlockSpecs: every operand is mapped whole into VMEM with a
    # single buffer (no double-buffering), the kernel body runs exactly once.
    logits = pl.pallas_call(
        gmlp_fused_kernel,
        out_shape=jax.ShapeDtypeStruct((M, V), jnp.float32),
        cost_estimate=cost,
    )(*args)
    return logits.reshape(B, T, V)


# --------------------------- pure-JAX reference ------------------------------

def _ref_block(x, p):
    ln_g, ln_b, wi, bi, sln_g, sln_b, wc, bc, wo, bo = p
    h = _layer_norm_ref(x, ln_g, ln_b)
    u = _gelu_exact(h @ wi + bi)
    z = _layer_norm_ref(u, sln_g, sln_b)
    v = jnp.einsum("nm,bmd->bnd", wc, z) + jnp.broadcast_to(bc, (bc.shape[0],
                                                                 u.shape[-1]))
    return x + (v * u) @ wo + bo


def _ref_forward(ids, wte, block_params, fln_g, fln_b, wlm):
    x = jnp.take(wte, ids, axis=0).astype(jnp.float32)
    for p in block_params:
        x = _ref_block(x, p)
    return _layer_norm_ref(x, fln_g, fln_b) @ wlm


# ---------------------------------- main -------------------------------------

if __name__ == "__main__":
    B, T, D, N, V = 2, 16, 32, 2, 128
    H = 4 * D

    keys = iter(jax.random.split(jax.random.PRNGKey(0), 16))

    # Deterministic synthetic parameter init (shapes follow the module):
    wte = 0.02 * jax.random.normal(next(keys), (V, D), jnp.float32)

    block_params = []
    for _ in range(N):
        ln_g = jnp.ones((1, D), jnp.float32)
        ln_b = jnp.zeros((1, D), jnp.float32)
        wi = 0.02 * jax.random.normal(next(keys), (D, H), jnp.float32)   # proj_in
        bi = jnp.zeros((1, H), jnp.float32)
        sln_g = jnp.ones((1, H), jnp.float32)
        sln_b = jnp.zeros((1, H), jnp.float32)
        # fc_causal: lower-triangular (causal) token-mix weight, bias init = 1
        wc = jnp.tril(0.02 * jax.random.normal(next(keys), (T, T), jnp.float32))
        bc = jnp.ones((T, 1), jnp.float32)
        wo = 0.02 * jax.random.normal(next(keys), (H, D), jnp.float32)   # proj_out
        bo = jnp.zeros((1, D), jnp.float32)
        block_params.append((ln_g, ln_b, wi, bi, sln_g, sln_b, wc, bc, wo, bo))

    fln_g = jnp.ones((1, D), jnp.float32)
    fln_b = jnp.zeros((1, D), jnp.float32)
    wlm = 0.02 * jax.random.normal(next(keys), (D, V), jnp.float32)      # lm_head^T

    ids = jax.random.randint(next(keys), (B, T), 0, V, dtype=jnp.int32)

    # One-time param repack (packed small-param buffer, bf16 weights,
    # block-diag token-mix, lane-dense fc_causal bias).
    prepped = prep_params(block_params, fln_g, fln_b, wte, wlm, B, T)

    fwd = jax.jit(gmlp_forward)
    logits = fwd(ids, prepped)
    logits = jax.block_until_ready(logits)
    assert logits.shape == (B, T, V)

    # Reference is full f32 (PyTorch semantics); the kernel uses bf16 MXU
    # operands (single-pass matmuls), so tolerances are loosened accordingly.
    ref = _ref_forward(ids, wte, block_params, fln_g, fln_b, wlm)
    np.testing.assert_allclose(np.asarray(logits), np.asarray(ref),
                               rtol=5e-2, atol=1.5e-2)

    print("KERNEL_OK")
</pallas_src>

<mosaic_0001>
module attributes {stable_mosaic.version = 11 : i64} {
  func.func @gmlp_fused_kernel(%arg0: memref<32x1xi32, #tpu.memory_space<vmem>>, %arg1: memref<128x32xbf16, #tpu.memory_space<vmem>>, %arg2: memref<16x128xf32, #tpu.memory_space<vmem>>, %arg3: memref<2x32x128xbf16, #tpu.memory_space<vmem>>, %arg4: memref<2x32x32xbf16, #tpu.memory_space<vmem>>, %arg5: memref<2x32x128xf32, #tpu.memory_space<vmem>>, %arg6: memref<2x128x32xbf16, #tpu.memory_space<vmem>>, %arg7: memref<32x128xbf16, #tpu.memory_space<vmem>>, %arg8: memref<32x128xf32, #tpu.memory_space<vmem>>) attributes {dimension_semantics = [], scalar_prefetch = 0 : i64, scratch_operands = 0 : i64, tpu.core_type = #tpu.core_type<tc>} {
    %0 = tpu.iota {dimensions = array<i32: 1>} : vector<32x128xi32>
    %c0 = arith.constant 0 : index
    %c0_0 = arith.constant 0 : index
    %1 = vector.load %arg0[%c0, %c0_0] : memref<32x1xi32, #tpu.memory_space<vmem>>, vector<32x1xi32>
    %2 = vector.broadcast %1 : vector<32x1xi32> to vector<32x128xi32>
    %3 = arith.cmpi eq, %0, %2 : vector<32x128xi32>
    %cst = arith.constant 1.000000e+00 : f32
    %cst_1 = arith.constant 0.000000e+00 : f32
    %4 = vector.broadcast %cst : f32 to vector<32x128xf32>
    %5 = vector.broadcast %cst_1 : f32 to vector<32x128xf32>
    %6 = arith.select %3, %4, %5 : vector<32x128xi1>, vector<32x128xf32>
    %7 = arith.truncf %6 : vector<32x128xf32> to vector<32x128xbf16>
    %c0_2 = arith.constant 0 : index
    %c0_3 = arith.constant 0 : index
    %8 = vector.load %arg1[%c0_2, %c0_3] : memref<128x32xbf16, #tpu.memory_space<vmem>>, vector<128x32xbf16>
    %cst_4 = arith.constant dense<0.000000e+00> : vector<32x32xf32>
    %9 = tpu.matmul %7, %8, %cst_4 {dimension_numbers = #tpu.dot_dimension_numbers<[1], [0], [0], [1], [0, 0, 1, 1], [], []>} : vector<32x128xbf16>, vector<128x32xbf16>, vector<32x32xf32> -> vector<32x32xf32>
    %c0_5 = arith.constant 0 : index
    %c0_6 = arith.constant 0 : index
    %10 = vector.load %arg2[%c0_5, %c0_6] : memref<16x128xf32, #tpu.memory_space<vmem>>, vector<1x32xf32>
    %c1 = arith.constant 1 : index
    %c0_7 = arith.constant 0 : index
    %11 = vector.load %arg2[%c1, %c0_7] : memref<16x128xf32, #tpu.memory_space<vmem>>, vector<1x32xf32>
    %c2 = arith.constant 2 : index
    %c0_8 = arith.constant 0 : index
    %12 = vector.load %arg2[%c2, %c0_8] : memref<16x128xf32, #tpu.memory_space<vmem>>, vector<1x128xf32>
    %c3 = arith.constant 3 : index
    %c0_9 = arith.constant 0 : index
    %13 = vector.load %arg2[%c3, %c0_9] : memref<16x128xf32, #tpu.memory_space<vmem>>, vector<1x128xf32>
    %c4 = arith.constant 4 : index
    %c0_10 = arith.constant 0 : index
    %14 = vector.load %arg2[%c4, %c0_10] : memref<16x128xf32, #tpu.memory_space<vmem>>, vector<1x128xf32>
    %c5 = arith.constant 5 : index
    %c0_11 = arith.constant 0 : index
    %15 = vector.load %arg2[%c5, %c0_11] : memref<16x128xf32, #tpu.memory_space<vmem>>, vector<1x32xf32>
    %cst_12 = arith.constant dense<0.000000e+00> : vector<32xf32>
    %16 = vector.multi_reduction <add>, %9, %cst_12 [1] : vector<32x32xf32> to vector<32xf32>
    %17 = vector.shape_cast %16 : vector<32xf32> to vector<32x1xf32>
    %18 = arith.mulf %9, %9 : vector<32x32xf32>
    %cst_13 = arith.constant dense<0.000000e+00> : vector<32xf32>
    %19 = vector.multi_reduction <add>, %18, %cst_13 [1] : vector<32x32xf32> to vector<32xf32>
    %20 = vector.shape_cast %19 : vector<32xf32> to vector<32x1xf32>
    %cst_14 = arith.constant 3.125000e-02 : f32
    %21 = vector.broadcast %cst_14 : f32 to vector<32x1xf32>
    %22 = arith.mulf %17, %21 : vector<32x1xf32>
    %cst_15 = arith.constant 3.125000e-02 : f32
    %23 = vector.broadcast %cst_15 : f32 to vector<32x1xf32>
    %24 = arith.mulf %20, %23 : vector<32x1xf32>
    %25 = arith.mulf %22, %22 : vector<32x1xf32>
    %26 = arith.subf %24, %25 : vector<32x1xf32>
    %27 = vector.broadcast %22 : vector<32x1xf32> to vector<32x32xf32>
    %28 = arith.subf %9, %27 : vector<32x32xf32>
    %cst_16 = arith.constant 9.99999974E-6 : f32
    %29 = vector.broadcast %cst_16 : f32 to vector<32x1xf32>
    %30 = arith.addf %26, %29 : vector<32x1xf32>
    %31 = math.rsqrt %30 : vector<32x1xf32>
    %32 = vector.broadcast %31 : vector<32x1xf32> to vector<32x32xf32>
    %33 = arith.mulf %28, %32 : vector<32x32xf32>
    %34 = vector.broadcast %10 : vector<1x32xf32> to vector<32x32xf32>
    %35 = arith.mulf %33, %34 : vector<32x32xf32>
    %36 = vector.broadcast %11 : vector<1x32xf32> to vector<32x32xf32>
    %37 = arith.addf %35, %36 : vector<32x32xf32>
    %38 = arith.truncf %37 : vector<32x32xf32> to vector<32x32xbf16>
    %c0_17 = arith.constant 0 : index
    %c0_18 = arith.constant 0 : index
    %c0_19 = arith.constant 0 : index
    %39 = vector.load %arg3[%c0_17, %c0_18, %c0_19] : memref<2x32x128xbf16, #tpu.memory_space<vmem>>, vector<1x32x128xbf16>
    %40 = vector.shape_cast %39 : vector<1x32x128xbf16> to vector<32x128xbf16>
    %cst_20 = arith.constant dense<0.000000e+00> : vector<32x128xf32>
    %41 = tpu.matmul %38, %40, %cst_20 {dimension_numbers = #tpu.dot_dimension_numbers<[1], [0], [0], [1], [0, 0, 1, 1], [], []>} : vector<32x32xbf16>, vector<32x128xbf16>, vector<32x128xf32> -> vector<32x128xf32>
    %42 = vector.broadcast %12 : vector<1x128xf32> to vector<32x128xf32>
    %43 = arith.addf %41, %42 : vector<32x128xf32>
    %cst_21 = arith.constant 5.000000e-01 : f32
    %44 = vector.broadcast %cst_21 : f32 to vector<32x128xf32>
    %45 = arith.mulf %44, %43 : vector<32x128xf32>
    %cst_22 = arith.constant 0.707106769 : f32
    %46 = vector.broadcast %cst_22 : f32 to vector<32x128xf32>
    %47 = arith.mulf %43, %46 : vector<32x128xf32>
    %48 = math.erf %47 : vector<32x128xf32>
    %cst_23 = arith.constant 1.000000e+00 : f32
    %49 = vector.broadcast %cst_23 : f32 to vector<32x128xf32>
    %50 = arith.addf %49, %48 : vector<32x128xf32>
    %51 = arith.mulf %45, %50 : vector<32x128xf32>
    %cst_24 = arith.constant dense<0.000000e+00> : vector<32xf32>
    %52 = vector.multi_reduction <add>, %51, %cst_24 [1] : vector<32x128xf32> to vector<32xf32>
    %53 = vector.shape_cast %52 : vector<32xf32> to vector<32x1xf32>
    %54 = arith.mulf %51, %51 : vector<32x128xf32>
    %cst_25 = arith.constant dense<0.000000e+00> : vector<32xf32>
    %55 = vector.multi_reduction <add>, %54, %cst_25 [1] : vector<32x128xf32> to vector<32xf32>
    %56 = vector.shape_cast %55 : vector<32xf32> to vector<32x1xf32>
    %cst_26 = arith.constant 7.812500e-03 : f32
    %57 = vector.broadcast %cst_26 : f32 to vector<32x1xf32>
    %58 = arith.mulf %53, %57 : vector<32x1xf32>
    %cst_27 = arith.constant 7.812500e-03 : f32
    %59 = vector.broadcast %cst_27 : f32 to vector<32x1xf32>
    %60 = arith.mulf %56, %59 : vector<32x1xf32>
    %61 = arith.mulf %58, %58 : vector<32x1xf32>
    %62 = arith.subf %60, %61 : vector<32x1xf32>
    %63 = vector.broadcast %58 : vector<32x1xf32> to vector<32x128xf32>
    %64 = arith.subf %51, %63 : vector<32x128xf32>
    %cst_28 = arith.constant 9.99999974E-6 : f32
    %65 = vector.broadcast %cst_28 : f32 to vector<32x1xf32>
    %66 = arith.addf %62, %65 : vector<32x1xf32>
    %67 = math.rsqrt %66 : vector<32x1xf32>
    %68 = vector.broadcast %67 : vector<32x1xf32> to vector<32x128xf32>
    %69 = arith.mulf %64, %68 : vector<32x128xf32>
    %70 = vector.broadcast %13 : vector<1x128xf32> to vector<32x128xf32>
    %71 = arith.mulf %69, %70 : vector<32x128xf32>
    %72 = vector.broadcast %14 : vector<1x128xf32> to vector<32x128xf32>
    %73 = arith.addf %71, %72 : vector<32x128xf32>
    %c0_29 = arith.constant 0 : index
    %c0_30 = arith.constant 0 : index
    %c0_31 = arith.constant 0 : index
    %74 = vector.load %arg4[%c0_29, %c0_30, %c0_31] : memref<2x32x32xbf16, #tpu.memory_space<vmem>>, vector<1x32x32xbf16>
    %75 = vector.shape_cast %74 : vector<1x32x32xbf16> to vector<32x32xbf16>
    %76 = arith.truncf %73 : vector<32x128xf32> to vector<32x128xbf16>
    %cst_32 = arith.constant dense<0.000000e+00> : vector<32x128xf32>
    %77 = tpu.matmul %75, %76, %cst_32 {dimension_numbers = #tpu.dot_dimension_numbers<[1], [0], [0], [1], [0, 0, 1, 1], [], []>} : vector<32x32xbf16>, vector<32x128xbf16>, vector<32x128xf32> -> vector<32x128xf32>
    %c0_33 = arith.constant 0 : index
    %c0_34 = arith.constant 0 : index
    %c0_35 = arith.constant 0 : index
    %78 = vector.load %arg5[%c0_33, %c0_34, %c0_35] : memref<2x32x128xf32, #tpu.memory_space<vmem>>, vector<1x32x128xf32>
    %79 = vector.shape_cast %78 : vector<1x32x128xf32> to vector<32x128xf32>
    %80 = arith.addf %77, %79 : vector<32x128xf32>
    %81 = arith.mulf %80, %51 : vector<32x128xf32>
    %82 = arith.truncf %81 : vector<32x128xf32> to vector<32x128xbf16>
    %c0_36 = arith.constant 0 : index
    %c0_37 = arith.constant 0 : index
    %c0_38 = arith.constant 0 : index
    %83 = vector.load %arg6[%c0_36, %c0_37, %c0_38] : memref<2x128x32xbf16, #tpu.memory_space<vmem>>, vector<1x128x32xbf16>
    %84 = vector.shape_cast %83 : vector<1x128x32xbf16> to vector<128x32xbf16>
    %cst_39 = arith.constant dense<0.000000e+00> : vector<32x32xf32>
    %85 = tpu.matmul %82, %84, %cst_39 {dimension_numbers = #tpu.dot_dimension_numbers<[1], [0], [0], [1], [0, 0, 1, 1], [], []>} : vector<32x128xbf16>, vector<128x32xbf16>, vector<32x32xf32> -> vector<32x32xf32>
    %86 = arith.addf %9, %85 : vector<32x32xf32>
    %87 = vector.broadcast %15 : vector<1x32xf32> to vector<32x32xf32>
    %88 = arith.addf %86, %87 : vector<32x32xf32>
    %c6 = arith.constant 6 : index
    %c0_40 = arith.constant 0 : index
    %89 = vector.load %arg2[%c6, %c0_40] : memref<16x128xf32, #tpu.memory_space<vmem>>, vector<1x32xf32>
    %c7 = arith.constant 7 : index
    %c0_41 = arith.constant 0 : index
    %90 = vector.load %arg2[%c7, %c0_41] : memref<16x128xf32, #tpu.memory_space<vmem>>, vector<1x32xf32>
    %c8 = arith.constant 8 : index
    %c0_42 = arith.constant 0 : index
    %91 = vector.load %arg2[%c8, %c0_42] : memref<16x128xf32, #tpu.memory_space<vmem>>, vector<1x128xf32>
    %c9 = arith.constant 9 : index
    %c0_43 = arith.constant 0 : index
    %92 = vector.load %arg2[%c9, %c0_43] : memref<16x128xf32, #tpu.memory_space<vmem>>, vector<1x128xf32>
    %c10 = arith.constant 10 : index
    %c0_44 = arith.constant 0 : index
    %93 = vector.load %arg2[%c10, %c0_44] : memref<16x128xf32, #tpu.memory_space<vmem>>, vector<1x128xf32>
    %c11 = arith.constant 11 : index
    %c0_45 = arith.constant 0 : index
    %94 = vector.load %arg2[%c11, %c0_45] : memref<16x128xf32, #tpu.memory_space<vmem>>, vector<1x32xf32>
    %cst_46 = arith.constant dense<0.000000e+00> : vector<32xf32>
    %95 = vector.multi_reduction <add>, %88, %cst_46 [1] : vector<32x32xf32> to vector<32xf32>
    %96 = vector.shape_cast %95 : vector<32xf32> to vector<32x1xf32>
    %97 = arith.mulf %88, %88 : vector<32x32xf32>
    %cst_47 = arith.constant dense<0.000000e+00> : vector<32xf32>
    %98 = vector.multi_reduction <add>, %97, %cst_47 [1] : vector<32x32xf32> to vector<32xf32>
    %99 = vector.shape_cast %98 : vector<32xf32> to vector<32x1xf32>
    %cst_48 = arith.constant 3.125000e-02 : f32
    %100 = vector.broadcast %cst_48 : f32 to vector<32x1xf32>
    %101 = arith.mulf %96, %100 : vector<32x1xf32>
    %cst_49 = arith.constant 3.125000e-02 : f32
    %102 = vector.broadcast %cst_49 : f32 to vector<32x1xf32>
    %103 = arith.mulf %99, %102 : vector<32x1xf32>
    %104 = arith.mulf %101, %101 : vector<32x1xf32>
    %105 = arith.subf %103, %104 : vector<32x1xf32>
    %106 = vector.broadcast %101 : vector<32x1xf32> to vector<32x32xf32>
    %107 = arith.subf %88, %106 : vector<32x32xf32>
    %cst_50 = arith.constant 9.99999974E-6 : f32
    %108 = vector.broadcast %cst_50 : f32 to vector<32x1xf32>
    %109 = arith.addf %105, %108 : vector<32x1xf32>
    %110 = math.rsqrt %109 : vector<32x1xf32>
    %111 = vector.broadcast %110 : vector<32x1xf32> to vector<32x32xf32>
    %112 = arith.mulf %107, %111 : vector<32x32xf32>
    %113 = vector.broadcast %89 : vector<1x32xf32> to vector<32x32xf32>
    %114 = arith.mulf %112, %113 : vector<32x32xf32>
    %115 = vector.broadcast %90 : vector<1x32xf32> to vector<32x32xf32>
    %116 = arith.addf %114, %115 : vector<32x32xf32>
    %117 = arith.truncf %116 : vector<32x32xf32> to vector<32x32xbf16>
    %c1_51 = arith.constant 1 : index
    %c0_52 = arith.constant 0 : index
    %c0_53 = arith.constant 0 : index
    %118 = vector.load %arg3[%c1_51, %c0_52, %c0_53] : memref<2x32x128xbf16, #tpu.memory_space<vmem>>, vector<1x32x128xbf16>
    %119 = vector.shape_cast %118 : vector<1x32x128xbf16> to vector<32x128xbf16>
    %cst_54 = arith.constant dense<0.000000e+00> : vector<32x128xf32>
    %120 = tpu.matmul %117, %119, %cst_54 {dimension_numbers = #tpu.dot_dimension_numbers<[1], [0], [0], [1], [0, 0, 1, 1], [], []>} : vector<32x32xbf16>, vector<32x128xbf16>, vector<32x128xf32> -> vector<32x128xf32>
    %121 = vector.broadcast %91 : vector<1x128xf32> to vector<32x128xf32>
    %122 = arith.addf %120, %121 : vector<32x128xf32>
    %cst_55 = arith.constant 5.000000e-01 : f32
    %123 = vector.broadcast %cst_55 : f32 to vector<32x128xf32>
    %124 = arith.mulf %123, %122 : vector<32x128xf32>
    %cst_56 = arith.constant 0.707106769 : f32
    %125 = vector.broadcast %cst_56 : f32 to vector<32x128xf32>
    %126 = arith.mulf %122, %125 : vector<32x128xf32>
    %127 = math.erf %126 : vector<32x128xf32>
    %cst_57 = arith.constant 1.000000e+00 : f32
    %128 = vector.broadcast %cst_57 : f32 to vector<32x128xf32>
    %129 = arith.addf %128, %127 : vector<32x128xf32>
    %130 = arith.mulf %124, %129 : vector<32x128xf32>
    %cst_58 = arith.constant dense<0.000000e+00> : vector<32xf32>
    %131 = vector.multi_reduction <add>, %130, %cst_58 [1] : vector<32x128xf32> to vector<32xf32>
    %132 = vector.shape_cast %131 : vector<32xf32> to vector<32x1xf32>
    %133 = arith.mulf %130, %130 : vector<32x128xf32>
    %cst_59 = arith.constant dense<0.000000e+00> : vector<32xf32>
    %134 = vector.multi_reduction <add>, %133, %cst_59 [1] : vector<32x128xf32> to vector<32xf32>
    %135 = vector.shape_cast %134 : vector<32xf32> to vector<32x1xf32>
    %cst_60 = arith.constant 7.812500e-03 : f32
    %136 = vector.broadcast %cst_60 : f32 to vector<32x1xf32>
    %137 = arith.mulf %132, %136 : vector<32x1xf32>
    %cst_61 = arith.constant 7.812500e-03 : f32
    %138 = vector.broadcast %cst_61 : f32 to vector<32x1xf32>
    %139 = arith.mulf %135, %138 : vector<32x1xf32>
    %140 = arith.mulf %137, %137 : vector<32x1xf32>
    %141 = arith.subf %139, %140 : vector<32x1xf32>
    %142 = vector.broadcast %137 : vector<32x1xf32> to vector<32x128xf32>
    %143 = arith.subf %130, %142 : vector<32x128xf32>
    %cst_62 = arith.constant 9.99999974E-6 : f32
    %144 = vector.broadcast %cst_62 : f32 to vector<32x1xf32>
    %145 = arith.addf %141, %144 : vector<32x1xf32>
    %146 = math.rsqrt %145 : vector<32x1xf32>
    %147 = vector.broadcast %146 : vector<32x1xf32> to vector<32x128xf32>
    %148 = arith.mulf %143, %147 : vector<32x128xf32>
    %149 = vector.broadcast %92 : vector<1x128xf32> to vector<32x128xf32>
    %150 = arith.mulf %148, %149 : vector<32x128xf32>
    %151 = vector.broadcast %93 : vector<1x128xf32> to vector<32x128xf32>
    %152 = arith.addf %150, %151 : vector<32x128xf32>
    %c1_63 = arith.constant 1 : index
    %c0_64 = arith.constant 0 : index
    %c0_65 = arith.constant 0 : index
    %153 = vector.load %arg4[%c1_63, %c0_64, %c0_65] : memref<2x32x32xbf16, #tpu.memory_space<vmem>>, vector<1x32x32xbf16>
    %154 = vector.shape_cast %153 : vector<1x32x32xbf16> to vector<32x32xbf16>
    %155 = arith.truncf %152 : vector<32x128xf32> to vector<32x128xbf16>
    %cst_66 = arith.constant dense<0.000000e+00> : vector<32x128xf32>
    %156 = tpu.matmul %154, %155, %cst_66 {dimension_numbers = #tpu.dot_dimension_numbers<[1], [0], [0], [1], [0, 0, 1, 1], [], []>} : vector<32x32xbf16>, vector<32x128xbf16>, vector<32x128xf32> -> vector<32x128xf32>
    %c1_67 = arith.constant 1 : index
    %c0_68 = arith.constant 0 : index
    %c0_69 = arith.constant 0 : index
    %157 = vector.load %arg5[%c1_67, %c0_68, %c0_69] : memref<2x32x128xf32, #tpu.memory_space<vmem>>, vector<1x32x128xf32>
    %158 = vector.shape_cast %157 : vector<1x32x128xf32> to vector<32x128xf32>
    %159 = arith.addf %156, %158 : vector<32x128xf32>
    %160 = arith.mulf %159, %130 : vector<32x128xf32>
    %161 = arith.truncf %160 : vector<32x128xf32> to vector<32x128xbf16>
    %c1_70 = arith.constant 1 : index
    %c0_71 = arith.constant 0 : index
    %c0_72 = arith.constant 0 : index
    %162 = vector.load %arg6[%c1_70, %c0_71, %c0_72] : memref<2x128x32xbf16, #tpu.memory_space<vmem>>, vector<1x128x32xbf16>
    %163 = vector.shape_cast %162 : vector<1x128x32xbf16> to vector<128x32xbf16>
    %cst_73 = arith.constant dense<0.000000e+00> : vector<32x32xf32>
    %164 = tpu.matmul %161, %163, %cst_73 {dimension_numbers = #tpu.dot_dimension_numbers<[1], [0], [0], [1], [0, 0, 1, 1], [], []>} : vector<32x128xbf16>, vector<128x32xbf16>, vector<32x32xf32> -> vector<32x32xf32>
    %165 = arith.addf %88, %164 : vector<32x32xf32>
    %166 = vector.broadcast %94 : vector<1x32xf32> to vector<32x32xf32>
    %167 = arith.addf %165, %166 : vector<32x32xf32>
    %c12 = arith.constant 12 : index
    %c0_74 = arith.constant 0 : index
    %168 = vector.load %arg2[%c12, %c0_74] : memref<16x128xf32, #tpu.memory_space<vmem>>, vector<1x32xf32>
    %c13 = arith.constant 13 : index
    %c0_75 = arith.constant 0 : index
    %169 = vector.load %arg2[%c13, %c0_75] : memref<16x128xf32, #tpu.memory_space<vmem>>, vector<1x32xf32>
    %cst_76 = arith.constant dense<0.000000e+00> : vector<32xf32>
    %170 = vector.multi_reduction <add>, %167, %cst_76 [1] : vector<32x32xf32> to vector<32xf32>
    %171 = vector.shape_cast %170 : vector<32xf32> to vector<32x1xf32>
    %172 = arith.mulf %167, %167 : vector<32x32xf32>
    %cst_77 = arith.constant dense<0.000000e+00> : vector<32xf32>
    %173 = vector.multi_reduction <add>, %172, %cst_77 [1] : vector<32x32xf32> to vector<32xf32>
    %174 = vector.shape_cast %173 : vector<32xf32> to vector<32x1xf32>
    %cst_78 = arith.constant 3.125000e-02 : f32
    %175 = vector.broadcast %cst_78 : f32 to vector<32x1xf32>
    %176 = arith.mulf %171, %175 : vector<32x1xf32>
    %cst_79 = arith.constant 3.125000e-02 : f32
    %177 = vector.broadcast %cst_79 : f32 to vector<32x1xf32>
    %178 = arith.mulf %174, %177 : vector<32x1xf32>
    %179 = arith.mulf %176, %176 : vector<32x1xf32>
    %180 = arith.subf %178, %179 : vector<32x1xf32>
    %181 = vector.broadcast %176 : vector<32x1xf32> to vector<32x32xf32>
    %182 = arith.subf %167, %181 : vector<32x32xf32>
    %cst_80 = arith.constant 9.99999974E-6 : f32
    %183 = vector.broadcast %cst_80 : f32 to vector<32x1xf32>
    %184 = arith.addf %180, %183 : vector<32x1xf32>
    %185 = math.rsqrt %184 : vector<32x1xf32>
    %186 = vector.broadcast %185 : vector<32x1xf32> to vector<32x32xf32>
    %187 = arith.mulf %182, %186 : vector<32x32xf32>
    %188 = vector.broadcast %168 : vector<1x32xf32> to vector<32x32xf32>
    %189 = arith.mulf %187, %188 : vector<32x32xf32>
    %190 = vector.broadcast %169 : vector<1x32xf32> to vector<32x32xf32>
    %191 = arith.addf %189, %190 : vector<32x32xf32>
    %192 = arith.truncf %191 : vector<32x32xf32> to vector<32x32xbf16>
    %c0_81 = arith.constant 0 : index
    %c0_82 = arith.constant 0 : index
    %193 = vector.load %arg7[%c0_81, %c0_82] : memref<32x128xbf16, #tpu.memory_space<vmem>>, vector<32x128xbf16>
    %cst_83 = arith.constant dense<0.000000e+00> : vector<32x128xf32>
    %194 = tpu.matmul %192, %193, %cst_83 {dimension_numbers = #tpu.dot_dimension_numbers<[1], [0], [0], [1], [0, 0, 1, 1], [], []>} : vector<32x32xbf16>, vector<32x128xbf16>, vector<32x128xf32> -> vector<32x128xf32>
    %c0_84 = arith.constant 0 : index
    %c0_85 = arith.constant 0 : index
    %195 = vector.load %arg8[%c0_84, %c0_85] : memref<32x128xf32, #tpu.memory_space<vmem>>, vector<32x128xf32>
    tpu.vector_store %arg8[%c0_84, %c0_85], %194 {strides = array<i32>} : memref<32x128xf32, #tpu.memory_space<vmem>>, vector<32x128xf32>,
    return
  }
}

</mosaic_0001>

<bundles_post_ra>
// kernel: gmlp_forward.1
= control target key start
LH: loop header
LB: loop body
LE: loop exit
PB: predicated region body
PF: predicated region fallthrough
CT: control target
= control target key end

     0   :  { %v1613_v2 = vmov 0   ;;  %s2016_s0 = inlined_call_operand.vmem [shape: s32[32,1], index: 0, kind: input, shape index: {}]   ;;  %s2017_s1 = inlined_call_operand.vmem [shape: bf16[128,32], index: 1, kind: input, shape index: {}]   ;;  %s2018_s2 = inlined_call_operand.vmem [shape: f32[16,128], index: 2, kind: input, shape index: {}]   ;;  %s2019_s3 = inlined_call_operand.vmem [shape: bf16[2,32,128], index: 3, kind: input, shape index: {}]   ;;  %s2020_s4 = inlined_call_operand.vmem [shape: bf16[2,32,32], index: 4, kind: input, shape index: {}]   ;;  %s2021_s5 = inlined_call_operand.vmem [shape: f32[2,32,128], index: 5, kind: input, shape index: {}]   ;;  %s2022_s6 = inlined_call_operand.vmem [shape: bf16[2,128,32], index: 6, kind: input, shape index: {}]   ;;  %s2023_s7 = inlined_call_operand.vmem [shape: bf16[32,128], index: 7, kind: input, shape index: {}]   ;;  %s2024_s8 = inlined_call_operand.hbm [shape: f32[32,128], index: 8, kind: output, shape index: {}]  }
   0x1   :  { %v35_v0 = vld [vmem:[%s2016_s0 + $0x10] sm:$0xff]  ;;  %v33_v1 = vld [vmem:[%s2016_s0] sm:$0xff]  ;;  %1500 = vset.pattern.permute.xlu1 %v1613_v2  ;;  %1499 = vset.pattern.permute.xlu0 %v1613_v2  ;;  %v36_v3 = vld [vmem:[%s2016_s0 + $0x18] sm:$0xff] }
   0x2   :  { %v34_v4 = vld [vmem:[%s2016_s0 + $0x8] sm:$0xff]  ;;  %44 = vperm.xlu1 %1500, %v35_v0   ;;  %38 = vperm.xlu0 %1499, %v33_v1   ;;  %v1501_v5 = vld [vmem:[%s2017_s1 + $0x38] sm:$0xff]   ;;  %v1502_v6 = vld [vmem:[%s2017_s1 + $0x30] sm:$0xff]  }
   0x3   :  { %1394 = vmatprep.subr.bf16.mxu0 %v1501_v5  ;;  %v1503_v7 = vld [vmem:[%s2017_s1 + $0x28] sm:$0xff]   ;;  %v1504_v8 = vld [vmem:[%s2017_s1 + $0x20] sm:$0xff]   ;;  %v1505_v9 = vld [vmem:[%s2017_s1 + $0x18] sm:$0xff]  }
   0x4   :  { %1395 = vmatpush3.bf16.msra.mxu0 %v1501_v5  ;;  %v1506_v10 = vld [vmem:[%s2017_s1 + $0x10] sm:$0xff]   ;;  %v1507_v11 = vld [vmem:[%s2017_s1 + $0x8] sm:$0xff]   ;;  %v1508_v12 = vld [vmem:[%s2017_s1] sm:$0xff]  }
   0x5   :  { %1396 = vmatprep.subr.bf16.mxu0 %v1502_v6 }
   0x6   :  { %47 = vperm.xlu1 %1500, %v36_v3   ;;  %41 = vperm.xlu0 %1499, %v34_v4  }
   0x8   :  { %1397 = vmatpush3.bf16.msra.mxu0 %v1502_v6 }
   0x9   :  { %1398 = vmatprep.subr.bf16.mxu0 %v1503_v7 }
   0xc   :  { %1399 = vmatpush3.bf16.msra.mxu0 %v1503_v7 }
   0xd   :  { %1400 = vmatprep.subr.bf16.mxu0 %v1504_v8 }
  0x10   :  { %1401 = vmatpush3.bf16.msra.mxu0 %v1504_v8 }
  0x11   :  { %1402 = vmatprep.subr.bf16.mxu0 %v1505_v9 }
  0x14   :  { %1403 = vmatpush3.bf16.msra.mxu0 %v1505_v9 }
  0x15   :  { %1404 = vmatprep.subr.bf16.mxu0 %v1506_v10 }
  0x18   :  { %1405 = vmatpush3.bf16.msra.mxu0 %v1506_v10 }
  0x19   :  { %1406 = vmatprep.subr.bf16.mxu0 %v1507_v11 }
  0x1a   :  { %13 = vsyncpa [#allocation3], 0  ;;  %v31_v13 = vlaneseq  ;;  %v1614_v19 = vmov 1.0|1.0   ;;  %vm178_vm6 = vcmask 261120   ;;  %v1509_v36 = vld [vmem:[%s2019_s3 + $0x8] sm:$0xff]  }
  0x1b   :  { %v1510_v37 = vld [vmem:[%s2019_s3] sm:$0xff]   ;;  %1414 = vmatprep.subr.bf16.mxu1 %v1509_v36  ;;  %s1615_s22 = smov [#allocation2]  }
  0x1c   :  { %1407 = vmatpush3.bf16.msra.mxu0 %v1507_v11  ;;  %v32_v16 = vand.u32 127, %v31_v13  ;;  %1415 = vmatpush3.bf16.msra.mxu1 %v1509_v36  ;;  %v1266_v5 = vld [vmem:[%s2018_s2] ss:$0 sm:$0xff] }
  0x1d   :  { %1408 = vmatprep.subr.bf16.mxu0 %v1508_v12  ;;  %1416 = vmatprep.subr.bf16.mxu1 %v1510_v37 }
  0x20   :  { %1409 = vmatpush3.bf16.msra.mxu0 %v1508_v12  ;;  %1417 = vmatpush3.bf16.msra.mxu1 %v1510_v37  ;;  %v1267_v12 = vld [vmem:[%s2018_s2 + $0x1] ss:$0 sm:$0xff] }
  0x7d   :  { %v45_v14 = vpop.permute.xlu1 %44  ;;  %v39_v15 = vpop.permute.xlu0 %38 }
  0x7e   :  { %vm51_vm0 = vcmp.eq.s32.totalorder %v32_v16, %v45_v14  ;;  %vm49_vm3 = vcmp.eq.s32.totalorder %v32_v16, %v39_v15 }
  0x81   :  { %v48_v17 = vpop.permute.xlu1 %47  ;;  %v42_v18 = vpop.permute.xlu0 %41 }
  0x82   :  { %vm52_vm1 = vcmp.eq.s32.totalorder %v32_v16, %v48_v17  ;;  %vm50_vm2 = vcmp.eq.s32.totalorder %v32_v16, %v42_v18 }
  0x83   :  { %vm1264_vm4 = vmpackc.low %vm52_vm1, %vm51_vm0 }
  0x84   :  { %vm1262_vm5 = vmpackc.low %vm50_vm2, %vm49_vm3 }
  0x85   :  { %1410 = vmatprep.mubr.msk.bf16.mxu0 %vm1262_vm5, %v1614_v19 }
  0x86   :  { %1411 = vmatmul.mubr.msk.bf16.vlgmr.msra.gmra.mxu0 %vm1264_vm4, %v1614_v19 }
 0x146   :  { %v1699_v20 = vpop.f32.mrf.mxu0 }
 0x147   :  { %v185_v21 = vsel %vm178_vm6, %v1699_v20, 0.0  ;;  %v193_v31 = vmul.f32 %v1699_v20, %v1699_v20 }
 0x148   :  { %186 = vadd.xlane.f32.xlu0 %v185_v21  ;;  %v1703_v22 = vpop.f32.mrf.mxu0 }
 0x149   :  { %v191_v23 = vmul.f32 %v1703_v22, %v1703_v22  ;;  %v179_v26 = vsel %vm178_vm6, %v1703_v22, 0.0  ;;  %v201_v33 = vsel %vm178_vm6, %v193_v31, 0.0 }
 0x14a   :  { %v1707_v24 = vpop.f32.mrf.mxu0 }
 0x14b   :  { %v195_v25 = vsel %vm178_vm6, %v191_v23, 0.0  ;;  %v188_v28 = vsel %vm178_vm6, %v1707_v24, 0.0  ;;  %v194_v34 = vmul.f32 %v1707_v24, %v1707_v24 }
 0x14c   :  { %196 = vadd.xlane.f32.xlu1 %v195_v25  ;;  %180 = vadd.xlane.f32.xlu0 %v179_v26  ;;  %v1712_v27 = vpop.f32.mrf.mxu0 }
 0x14d   :  { %v182_v29 = vsel %vm178_vm6, %v1712_v27, 0.0  ;;  %v192_v30 = vmul.f32 %v1712_v27, %v1712_v27  ;;  %v204_v35 = vsel %vm178_vm6, %v194_v34, 0.0 }
 0x14f   :  { %v198_v32 = vsel %vm178_vm6, %v192_v30, 0.0  ;;  %v1268_v30 = vld [vmem:[%s2018_s2 + $0x2] ss:$0 sm:$0xff] }
 0x150   :  { %189 = vadd.xlane.f32.xlu0 %v188_v28  ;;  %183 = vadd.xlane.f32.xlu1 %v182_v29 }
 0x154   :  { %199 = vadd.xlane.f32.xlu0 %v198_v32  ;;  %202 = vadd.xlane.f32.xlu1 %v201_v33 }
 0x158   :  { %205 = vadd.xlane.f32.xlu0 %v204_v35 }
 0x1d1   :  { %v187_v38 = vpop.xlane.xlu0 %186 }
 0x1d2   :  { %v209_v44 = vmul.f32 0.03125, %v187_v38 }
 0x1d4   :  { %v217_v50 = vmul.f32 %v209_v44, %v209_v44  ;;  %v225_v8 = vsub.f32 %v1699_v20, %v209_v44 }
 0x1d5   :  { %v197_v39 = vpop.xlane.xlu1 %196  ;;  %v181_v40 = vpop.xlane.xlu0 %180 }
 0x1d6   :  { %v207_v41 = vmul.f32 0.03125, %v181_v40  ;;  %v211_v42 = vmul.f32 0.03125, %v197_v39 }
 0x1d8   :  { %v215_v43 = vmul.f32 %v207_v41, %v207_v41  ;;  %v223_v3 = vsub.f32 %v1703_v22, %v207_v41 }
 0x1d9   :  { %v190_v45 = vpop.xlane.xlu0 %189  ;;  %v184_v46 = vpop.xlane.xlu1 %183 }
 0x1da   :  { %v219_v47 = vsub.f32 %v211_v42, %v215_v43  ;;  %v208_v48 = vmul.f32 0.03125, %v184_v46  ;;  %v210_v51 = vmul.f32 0.03125, %v190_v45 }
 0x1dc   :  { %v227_v49 = vadd.f32 1e-05, %v219_v47  ;;  %v216_v54 = vmul.f32 %v208_v48, %v208_v48  ;;  %v218_v60 = vmul.f32 %v210_v51, %v210_v51  ;;  %v224_v6 = vsub.f32 %v1712_v27, %v208_v48 }
 0x1dd   :  { %v200_v52 = vpop.xlane.xlu0 %199  ;;  %v203_v53 = vpop.xlane.xlu1 %202  ;;  %v226_v14 = vsub.f32 %v1707_v24, %v210_v51 }
 0x1de   :  { %1535 = vrsqrt.f32 %v227_v49  ;;  %v212_v55 = vmul.f32 0.03125, %v200_v52  ;;  %v213_v56 = vmul.f32 0.03125, %v203_v53 }
 0x1e0   :  { %v220_v57 = vsub.f32 %v212_v55, %v216_v54  ;;  %v221_v58 = vsub.f32 %v213_v56, %v217_v50 }
 0x1e1   :  { %v206_v59 = vpop.xlane.xlu0 %205 }
 0x1e2   :  { %v228_v61 = vadd.f32 1e-05, %v220_v57  ;;  %v229_v62 = vadd.f32 1e-05, %v221_v58  ;;  %v214_v63 = vmul.f32 0.03125, %v206_v59 }
 0x1e4   :  { %1537 = vrsqrt.f32 %v228_v61  ;;  %v222_v0 = vsub.f32 %v214_v63, %v218_v60  ;;  %v1511_v63 = vld [vmem:[%s2020_s4] sm:$0xff]  }
 0x1e5   :  { %1539 = vrsqrt.f32 %v229_v62 }
 0x1e6   :  { %v230_v1 = vadd.f32 1e-05, %v222_v0 }
 0x1e8   :  { %1541 = vrsqrt.f32 %v230_v1 }
 0x1eb   :  { %v1536_v2 = vpop.eup %1535 }
 0x1ec   :  { %v235_v4 = vmul.f32 %v1536_v2, %v223_v3 }
 0x1ee   :  { %v243_v11 = vmul.f32 %v1266_v5, %v235_v4 }
 0x1f0   :  { %v251_v17 = vadd.f32 %v1267_v12, %v243_v11 }
 0x1f1   :  { %v1538_v7 = vpop.eup %1537 }
 0x1f2   :  { %v1540_v9 = vpop.eup %1539  ;;  %v236_v10 = vmul.f32 %v1538_v7, %v224_v6 }
 0x1f3   :  { %v237_v13 = vmul.f32 %v1540_v9, %v225_v8 }
 0x1f4   :  { %v244_v15 = vmul.f32 %v1266_v5, %v236_v10 }
 0x1f5   :  { %v1542_v16 = vpop.eup %1541  ;;  %v245_v21 = vmul.f32 %v1266_v5, %v237_v13 }
 0x1f6   :  { %v252_v18 = vadd.f32 %v1267_v12, %v244_v15  ;;  %v238_v19 = vmul.f32 %v1542_v16, %v226_v14 }
 0x1f7   :  { %v253_v26 = vadd.f32 %v1267_v12, %v245_v21 }
 0x1f8   :  { %v255_v23 = vpack.c.bf16 %v252_v18, %v251_v17  ;;  %v246_v25 = vmul.f32 %v1266_v5, %v238_v19 }
 0x1fa   :  { %1418 = vmatprep.mubr.msk.bf16.mxu1 %vm178_vm6, %v255_v23  ;;  %v254_v28 = vadd.f32 %v1267_v12, %v246_v25 }
 0x1fc   :  { %v256_v29 = vpack.c.bf16 %v254_v28, %v253_v26 }
 0x1fe   :  { %1419 = vmatmul.mubr.msk.bf16.vlgmr.msra.gmra.mxu1 %vm178_vm6, %v256_v29 }
 0x1ff   :  { %1426 = vmatprep.mubr.msk.bf16.mxu1 %vm178_vm6, %v1511_v63  ;;  %v1515_v63 = vld [vmem:[%s2022_s6 + $0x28] sm:$0xff]  }
 0x2be   :  { %v1420_v31 = vpop.f32.mrf.mxu1 }
 0x2bf   :  { %v326_v32 = vadd.f32 %v1420_v31, %v1268_v30 }
 0x2c0   :  { %v317_v33 = vpop.f32.mrf.mxu1 }
 0x2c1   :  { %v338_v34 = vmul.f32 0.70710677, %v326_v32  ;;  %v318_v35 = vadd.f32 %v1268_v30, %v317_v33  ;;  %v334_v44 = vmul.f32 0.5, %v326_v32 }
 0x2c2   :  { %v1421_v36 = vpop.f32.mrf.mxu1 }
 0x2c3   :  { %1543 = verf.f32 %v338_v34  ;;  %v336_v37 = vmul.f32 0.70710677, %v318_v35  ;;  %v329_v38 = vadd.f32 %v1421_v36, %v1268_v30  ;;  %v332_v55 = vmul.f32 0.5, %v318_v35  ;;  %v1273_v35 = vld [vmem:[%s2018_s2 + $0x3] ss:$0 sm:$0xff] }
 0x2c4   :  { %v320_v39 = vpop.f32.mrf.mxu1 }
 0x2c5   :  { %v339_v40 = vmul.f32 0.70710677, %v329_v38  ;;  %v321_v41 = vadd.f32 %v1268_v30, %v320_v39  ;;  %1545 = verf.f32 %v336_v37  ;;  %v335_v49 = vmul.f32 0.5, %v329_v38 }
 0x2c7   :  { %1547 = verf.f32 %v339_v40  ;;  %v337_v42 = vmul.f32 0.70710677, %v321_v41  ;;  %v333_v59 = vmul.f32 0.5, %v321_v41  ;;  %v1274_v40 = vld [vmem:[%s2018_s2 + $0x4] ss:$0 sm:$0xff] }
 0x2c9   :  { %1549 = verf.f32 %v337_v42 }
 0x2d0   :  { %v1544_v43 = vpop.eup %1543 }
 0x2d1   :  { %v346_v45 = vadd.f32 1.0, %v1544_v43 }
 0x2d2   :  { %v1546_v46 = vpop.eup %1545 }
 0x2d3   :  { %v1748_v47 = vmul.f32 %v346_v45, %v334_v44  ;;  %v344_v51 = vadd.f32 1.0, %v1546_v46 }
 0x2d4   :  { %v1548_v48 = vpop.eup %1547 }
 0x2d5   :  { %v347_v50 = vadd.f32 1.0, %v1548_v48  ;;  %356 = vadd.xlane.f32.xlu1 %v1748_v47  ;;  %v362_v53 = vmul.f32 %v1748_v47, %v1748_v47  ;;  %v1756_v56 = vmul.f32 %v344_v51, %v332_v55 }
 0x2d6   :  { %v1550_v54 = vpop.eup %1549 }
 0x2d7   :  { %v1751_v52 = vmul.f32 %v347_v50, %v335_v49  ;;  %v345_v57 = vadd.f32 1.0, %v1550_v54  ;;  %v360_v61 = vmul.f32 %v1756_v56, %v1756_v56 }
 0x2d9   :  { %368 = vadd.xlane.f32.xlu1 %v362_v53  ;;  %358 = vadd.xlane.f32.xlu0 %v1751_v52  ;;  %v363_v58 = vmul.f32 %v1751_v52, %v1751_v52  ;;  %v1761_v60 = vmul.f32 %v345_v57, %v333_v59  ;;  %v1513_v59 = vld [vmem:[%s2022_s6 + $0x38] sm:$0xff]  }
 0x2db   :  { %v361_v62 = vmul.f32 %v1761_v60, %v1761_v60 }
 0x2dd   :  { %370 = vadd.xlane.f32.xlu0 %v363_v58  ;;  %352 = vadd.xlane.f32.xlu1 %v1756_v56 }
 0x2e1   :  { %354 = vadd.xlane.f32.xlu0 %v1761_v60  ;;  %364 = vadd.xlane.f32.xlu1 %v360_v61  ;;  %v1512_v61 = vld [vmem:[%s2020_s4 + $0x8] sm:$0xff]  }
 0x2e5   :  { %366 = vadd.xlane.f32.xlu0 %v361_v62  ;;  %v1514_v62 = vld [vmem:[%s2022_s6 + $0x30] sm:$0xff]  }
 0x35e   :  { %v357_v0 = vpop.xlane.xlu1 %356 }
 0x35f   :  { %v374_v1 = vmul.f32 0.0078125, %v357_v0  ;;  %v1516_v0 = vld [vmem:[%s2022_s6 + $0x20] sm:$0xff]  }
 0x361   :  { %v382_v4 = vmul.f32 %v374_v1, %v374_v1  ;;  %v390_v32 = vsub.f32 %v1748_v47, %v374_v1  ;;  %v1517_v1 = vld [vmem:[%s2022_s6 + $0x18] sm:$0xff]  }
 0x362   :  { %v369_v2 = vpop.xlane.xlu1 %368  ;;  %v359_v3 = vpop.xlane.xlu0 %358 }
 0x363   :  { %v378_v5 = vmul.f32 0.0078125, %v369_v2  ;;  %v375_v6 = vmul.f32 0.0078125, %v359_v3  ;;  %v1518_v2 = vld [vmem:[%s2022_s6 + $0x10] sm:$0xff]   ;;  %v1519_v3 = vld [vmem:[%s2022_s6 + $0x8] sm:$0xff]  }
 0x365   :  { %v386_v7 = vsub.f32 %v378_v5, %v382_v4  ;;  %v383_v11 = vmul.f32 %v375_v6, %v375_v6  ;;  %v391_v36 = vsub.f32 %v1751_v52, %v375_v6  ;;  %v1520_v4 = vld [vmem:[%s2022_s6] sm:$0xff]  }
 0x366   :  { %v371_v8 = vpop.xlane.xlu0 %370  ;;  %v353_v9 = vpop.xlane.xlu1 %352 }
 0x367   :  { %v394_v10 = vadd.f32 1e-05, %v386_v7  ;;  %v379_v12 = vmul.f32 0.0078125, %v371_v8  ;;  %v372_v13 = vmul.f32 0.0078125, %v353_v9  ;;  %v426_v7 = vld [vmem:[%s2021_s5] sm:$0xff]  ;;  %v429_v8 = vld [vmem:[%s2021_s5 + $0x18] sm:$0xff] }
 0x368   :  { %v428_v9 = vld [vmem:[%s2021_s5 + $0x10] sm:$0xff] }
 0x369   :  { %1551 = vrsqrt.f32 %v394_v10  ;;  %v387_v14 = vsub.f32 %v379_v12, %v383_v11  ;;  %v380_v18 = vmul.f32 %v372_v13, %v372_v13  ;;  %v388_v41 = vsub.f32 %v1756_v56, %v372_v13  ;;  %v427_v11 = vld [vmem:[%s2021_s5 + $0x8] sm:$0xff] }
 0x36a   :  { %v355_v15 = vpop.xlane.xlu0 %354  ;;  %v365_v16 = vpop.xlane.xlu1 %364 }
 0x36b   :  { %v395_v17 = vadd.f32 1e-05, %v387_v14  ;;  %v373_v19 = vmul.f32 0.0078125, %v355_v15  ;;  %v376_v21 = vmul.f32 0.0078125, %v365_v16 }
 0x36d   :  { %1553 = vrsqrt.f32 %v395_v17  ;;  %v384_v23 = vsub.f32 %v376_v21, %v380_v18  ;;  %v381_v26 = vmul.f32 %v373_v19, %v373_v19  ;;  %v389_v48 = vsub.f32 %v1761_v60, %v373_v19 }
 0x36e   :  { %v367_v25 = vpop.xlane.xlu0 %366 }
 0x36f   :  { %v392_v28 = vadd.f32 1e-05, %v384_v23  ;;  %v377_v29 = vmul.f32 0.0078125, %v367_v25 }
 0x371   :  { %1555 = vrsqrt.f32 %v392_v28  ;;  %v385_v30 = vsub.f32 %v377_v29, %v381_v26  ;;  %v1287_v26 = vld [vmem:[%s2018_s2 + $0x5] ss:$0 sm:$0xff] }
 0x373   :  { %v393_v31 = vadd.f32 1e-05, %v385_v30 }
 0x375   :  { %1557 = vrsqrt.f32 %v393_v31 }
 0x376   :  { %v1552_v33 = vpop.eup %1551 }
 0x377   :  { %v402_v34 = vmul.f32 %v1552_v33, %v390_v32 }
 0x379   :  { %v410_v39 = vmul.f32 %v1273_v35, %v402_v34 }
 0x37a   :  { %v1554_v37 = vpop.eup %1553 }
 0x37b   :  { %v403_v38 = vmul.f32 %v1554_v37, %v391_v36  ;;  %v418_v44 = vadd.f32 %v1274_v40, %v410_v39 }
 0x37d   :  { %v411_v42 = vmul.f32 %v1273_v35, %v403_v38 }
 0x37e   :  { %v1556_v43 = vpop.eup %1555 }
 0x37f   :  { %v419_v45 = vadd.f32 %v1274_v40, %v411_v42  ;;  %v400_v46 = vmul.f32 %v1556_v43, %v388_v41 }
 0x381   :  { %v425_v49 = vpack.c.bf16 %v419_v45, %v418_v44  ;;  %v408_v53 = vmul.f32 %v1273_v35, %v400_v46  ;;  %v1521_v44 = vld [vmem:[%s2019_s3 + $0x18] sm:$0xff]   ;;  %v1522_v45 = vld [vmem:[%s2019_s3 + $0x10] sm:$0xff]  }
 0x382   :  { %v1558_v50 = vpop.eup %1557 }
 0x383   :  { %1422 = vmatprep.subr.bf16.mxu1 %v425_v49  ;;  %v401_v51 = vmul.f32 %v1558_v50, %v389_v48  ;;  %v416_v55 = vadd.f32 %v1274_v40, %v408_v53 }
 0x384   :  { %1423 = vmatpush3.bf16.msra.mxu1 %v425_v49 }
 0x385   :  { %v409_v54 = vmul.f32 %v1273_v35, %v401_v51 }
 0x387   :  { %v417_v57 = vadd.f32 %v1274_v40, %v409_v54 }
 0x389   :  { %v424_v58 = vpack.c.bf16 %v417_v57, %v416_v55 }
 0x38b   :  { %1424 = vmatprep.subr.bf16.mxu1 %v424_v58 }
 0x38c   :  { %1425 = vmatpush3.bf16.msra.mxu1 %v424_v58 }
 0x38d   :  { %1430 = vmatprep.subr.bf16.mxu1 %v1513_v59 }
 0x38f   :  { %1427 = vmatmul.mubr.msk.bf16.vlgmr.msra.gmra.mxu1 %vm178_vm6, %v1512_v61 }
 0x390   :  { %1431 = vmatpush3.bf16.msra.mxu1 %v1513_v59 }
 0x391   :  { %1432 = vmatprep.subr.bf16.mxu1 %v1514_v62 }
 0x394   :  { %1433 = vmatpush3.bf16.msra.mxu1 %v1514_v62 }
 0x395   :  { %1434 = vmatprep.subr.bf16.mxu1 %v1515_v63 }
 0x398   :  { %1435 = vmatpush3.bf16.msra.mxu1 %v1515_v63 }
 0x399   :  { %1436 = vmatprep.subr.bf16.mxu1 %v1516_v0 }
 0x39c   :  { %1437 = vmatpush3.bf16.msra.mxu1 %v1516_v0 }
 0x39d   :  { %1438 = vmatprep.subr.bf16.mxu1 %v1517_v1 }
 0x3a0   :  { %1439 = vmatpush3.bf16.msra.mxu1 %v1517_v1 }
 0x3a1   :  { %1440 = vmatprep.subr.bf16.mxu1 %v1518_v2 }
 0x3a4   :  { %1441 = vmatpush3.bf16.msra.mxu1 %v1518_v2 }
 0x3a5   :  { %1442 = vmatprep.subr.bf16.mxu1 %v1519_v3 }
 0x3a8   :  { %1443 = vmatpush3.bf16.msra.mxu1 %v1519_v3 }
 0x3a9   :  { %1444 = vmatprep.subr.bf16.mxu1 %v1520_v4 }
 0x3ac   :  { %1445 = vmatpush3.bf16.msra.mxu1 %v1520_v4 }
 0x3ad   :  { %1450 = vmatprep.subr.bf16.mxu1 %v1521_v44 }
 0x44f   :  { %v1428_v5 = vpop.f32.mrf.mxu1 }
 0x450   :  { %v489_v14 = vadd.f32 %v1428_v5, %v428_v9 }
 0x451   :  { %v480_v6 = vpop.f32.mrf.mxu1 }
 0x452   :  { %v481_v12 = vadd.f32 %v480_v6, %v426_v7  ;;  %v497_v21 = vmul.f32 %v489_v14, %v1748_v47 }
 0x453   :  { %v1429_v10 = vpop.f32.mrf.mxu1 }
 0x454   :  { %v492_v13 = vadd.f32 %v1429_v10, %v429_v8  ;;  %v495_v18 = vmul.f32 %v481_v12, %v1756_v56 }
 0x455   :  { %v483_v15 = vpop.f32.mrf.mxu1 }
 0x456   :  { %v484_v16 = vadd.f32 %v483_v15, %v427_v11  ;;  %v498_v17 = vmul.f32 %v492_v13, %v1751_v52 }
 0x458   :  { %v496_v19 = vmul.f32 %v484_v16, %v1761_v60  ;;  %v500_v25 = vpack.c.bf16 %v498_v17, %v497_v21 }
 0x45a   :  { %v499_v23 = vpack.c.bf16 %v496_v19, %v495_v18  ;;  %v1288_v18 = vld [vmem:[%s2018_s2 + $0x6] ss:$0 sm:$0xff] }
 0x45c   :  { %1446 = vmatprep.mubr.bf16.mxu1 %v499_v23 }
 0x45d   :  { %1447 = vmatmul.mubr.bf16.vlgmr.msra.gmra.mxu1 %v500_v25 }
 0x45e   :  { %1451 = vmatpush3.bf16.msra.mxu1 %v1521_v44 }
 0x45f   :  { %1452 = vmatprep.subr.bf16.mxu1 %v1522_v45 }
 0x462   :  { %1453 = vmatpush3.bf16.msra.mxu1 %v1522_v45 }
 0x51d   :  { %v1448_v28 = vpop.f32.mrf.mxu1 }
 0x51e   :  { %v616_v29 = vadd.f32 %v1448_v28, %v1699_v20 }
 0x51f   :  { %v599_v30 = vpop.f32.mrf.mxu1 }
 0x520   :  { %v1830_v31 = vadd.f32 %v1287_v26, %v616_v29  ;;  %v614_v52 = vadd.f32 %v599_v30, %v1703_v22  ;;  %v1289_v30 = vld [vmem:[%s2018_s2 + $0x7] ss:$0 sm:$0xff] }
 0x521   :  { %v1449_v56 = vpop.f32.mrf.mxu1 }
 0x522   :  { %v1833_v60 = vadd.f32 %v1287_v26, %v614_v52  ;;  %v617_v47 = vadd.f32 %v1449_v56, %v1707_v24  ;;  %v638_v32 = vsel %vm178_vm6, %v1830_v31, 0.0 }
 0x523   :  { %639 = vadd.xlane.f32.xlu1 %v638_v32  ;;  %v602_v33 = vpop.f32.mrf.mxu1 }
 0x524   :  { %v1838_v34 = vadd.f32 %v1287_v26, %v617_v47  ;;  %v615_v35 = vadd.f32 %v602_v33, %v1712_v27  ;;  %v632_v36 = vsel %vm178_vm6, %v1833_v60, 0.0  ;;  %v644_v24 = vmul.f32 %v1833_v60, %v1833_v60 }
 0x525   :  { %v646_v27 = vmul.f32 %v1830_v31, %v1830_v31 }
 0x526   :  { %v1841_v20 = vadd.f32 %v1287_v26, %v615_v35  ;;  %v641_v22 = vsel %vm178_vm6, %v1838_v34, 0.0  ;;  %v648_v37 = vsel %vm178_vm6, %v644_v24, 0.0  ;;  %v647_v42 = vmul.f32 %v1838_v34, %v1838_v34 }
 0x527   :  { %633 = vadd.xlane.f32.xlu1 %v632_v36  ;;  %642 = vadd.xlane.f32.xlu0 %v641_v22  ;;  %v654_v40 = vsel %vm178_vm6, %v646_v27, 0.0  ;;  %v1294_v27 = vld [vmem:[%s2018_s2 + $0x8] ss:$0 sm:$0xff] }
 0x528   :  { %v635_v38 = vsel %vm178_vm6, %v1841_v20, 0.0  ;;  %v645_v39 = vmul.f32 %v1841_v20, %v1841_v20  ;;  %v657_v43 = vsel %vm178_vm6, %v647_v42, 0.0 }
 0x52a   :  { %v651_v41 = vsel %vm178_vm6, %v645_v39, 0.0 }
 0x52b   :  { %649 = vadd.xlane.f32.xlu1 %v648_v37  ;;  %636 = vadd.xlane.f32.xlu0 %v635_v38 }
 0x52f   :  { %655 = vadd.xlane.f32.xlu1 %v654_v40  ;;  %652 = vadd.xlane.f32.xlu0 %v651_v41 }
 0x533   :  { %658 = vadd.xlane.f32.xlu0 %v657_v43 }
 0x5ac   :  { %v640_v46 = vpop.xlane.xlu1 %639 }
 0x5ad   :  { %v662_v51 = vmul.f32 0.03125, %v640_v46 }
 0x5af   :  { %v670_v61 = vmul.f32 %v662_v51, %v662_v51  ;;  %v678_v17 = vsub.f32 %v1830_v31, %v662_v51 }
 0x5b0   :  { %v634_v48 = vpop.xlane.xlu1 %633  ;;  %v643_v49 = vpop.xlane.xlu0 %642 }
 0x5b1   :  { %v660_v50 = vmul.f32 0.03125, %v634_v48  ;;  %v663_v62 = vmul.f32 0.03125, %v643_v49 }
 0x5b3   :  { %v668_v55 = vmul.f32 %v660_v50, %v660_v50  ;;  %v671_v8 = vmul.f32 %v663_v62, %v663_v62  ;;  %v676_v15 = vsub.f32 %v1833_v60, %v660_v50  ;;  %v679_v29 = vsub.f32 %v1838_v34, %v663_v62 }
 0x5b4   :  { %v650_v53 = vpop.xlane.xlu1 %649  ;;  %v637_v54 = vpop.xlane.xlu0 %636 }
 0x5b5   :  { %v664_v57 = vmul.f32 0.03125, %v650_v53  ;;  %v661_v58 = vmul.f32 0.03125, %v637_v54 }
 0x5b7   :  { %v672_v59 = vsub.f32 %v664_v57, %v668_v55  ;;  %v669_v2 = vmul.f32 %v661_v58, %v661_v58  ;;  %v677_v21 = vsub.f32 %v1841_v20, %v661_v58 }
 0x5b8   :  { %v656_v63 = vpop.xlane.xlu1 %655  ;;  %v653_v0 = vpop.xlane.xlu0 %652 }
 0x5b9   :  { %v680_v1 = vadd.f32 1e-05, %v672_v59  ;;  %v666_v3 = vmul.f32 0.03125, %v656_v63  ;;  %v665_v4 = vmul.f32 0.03125, %v653_v0 }
 0x5bb   :  { %1559 = vrsqrt.f32 %v680_v1  ;;  %v674_v5 = vsub.f32 %v666_v3, %v670_v61  ;;  %v673_v6 = vsub.f32 %v665_v4, %v669_v2 }
 0x5bc   :  { %v659_v7 = vpop.xlane.xlu0 %658 }
 0x5bd   :  { %v682_v9 = vadd.f32 1e-05, %v674_v5  ;;  %v681_v10 = vadd.f32 1e-05, %v673_v6  ;;  %v667_v11 = vmul.f32 0.03125, %v659_v7 }
 0x5bf   :  { %1561 = vrsqrt.f32 %v682_v9  ;;  %v675_v12 = vsub.f32 %v667_v11, %v671_v8  ;;  %v1523_v11 = vld [vmem:[%s2020_s4 + $0x10] sm:$0xff]  }
 0x5c0   :  { %1563 = vrsqrt.f32 %v681_v10  ;;  %1462 = vmatprep.mubr.msk.bf16.mxu0 %vm178_vm6, %v1523_v11  ;;  %v1527_v11 = vld [vmem:[%s2022_s6 + $0x68] sm:$0xff]  }
 0x5c1   :  { %v683_v13 = vadd.f32 1e-05, %v675_v12 }
 0x5c3   :  { %1565 = vrsqrt.f32 %v683_v13 }
 0x5c8   :  { %v1560_v14 = vpop.eup %1559 }
 0x5c9   :  { %v688_v16 = vmul.f32 %v1560_v14, %v676_v15 }
 0x5cb   :  { %v696_v28 = vmul.f32 %v1288_v18, %v688_v16 }
 0x5cc   :  { %v1562_v19 = vpop.eup %1561 }
 0x5cd   :  { %v1564_v23 = vpop.eup %1563  ;;  %v690_v25 = vmul.f32 %v1562_v19, %v678_v17  ;;  %v704_v33 = vadd.f32 %v1289_v30, %v696_v28 }
 0x5ce   :  { %v689_v26 = vmul.f32 %v1564_v23, %v677_v21 }
 0x5cf   :  { %v698_v32 = vmul.f32 %v1288_v18, %v690_v25 }
 0x5d0   :  { %v1566_v52 = vpop.eup %1565  ;;  %v697_v56 = vmul.f32 %v1288_v18, %v689_v26 }
 0x5d1   :  { %v691_v47 = vmul.f32 %v1566_v52, %v679_v29  ;;  %v706_v24 = vadd.f32 %v1289_v30, %v698_v32 }
 0x5d2   :  { %v705_v35 = vadd.f32 %v1289_v30, %v697_v56 }
 0x5d3   :  { %v699_v36 = vmul.f32 %v1288_v18, %v691_v47 }
 0x5d4   :  { %v708_v22 = vpack.c.bf16 %v705_v35, %v704_v33 }
 0x5d5   :  { %v707_v37 = vadd.f32 %v1289_v30, %v699_v36 }
 0x5d6   :  { %1454 = vmatprep.mubr.msk.bf16.mxu1 %vm178_vm6, %v708_v22 }
 0x5d7   :  { %v709_v38 = vpack.c.bf16 %v707_v37, %v706_v24 }
 0x5d9   :  { %1455 = vmatmul.mubr.msk.bf16.vlgmr.msra.gmra.mxu1 %vm178_vm6, %v709_v38 }
 0x699   :  { %v1456_v39 = vpop.f32.mrf.mxu1 }
 0x69a   :  { %v780_v40 = vadd.f32 %v1456_v39, %v1294_v27 }
 0x69b   :  { %v771_v41 = vpop.f32.mrf.mxu1 }
 0x69c   :  { %v792_v42 = vmul.f32 0.70710677, %v780_v40  ;;  %v772_v43 = vadd.f32 %v1294_v27, %v771_v41  ;;  %v788_v54 = vmul.f32 0.5, %v780_v40 }
 0x69d   :  { %v1457_v44 = vpop.f32.mrf.mxu1 }
 0x69e   :  { %1567 = verf.f32 %v792_v42  ;;  %v790_v45 = vmul.f32 0.70710677, %v772_v43  ;;  %v783_v46 = vadd.f32 %v1457_v44, %v1294_v27  ;;  %v786_v3 = vmul.f32 0.5, %v772_v43  ;;  %v1299_v43 = vld [vmem:[%s2018_s2 + $0x9] ss:$0 sm:$0xff] }
 0x69f   :  { %v774_v48 = vpop.f32.mrf.mxu1 }
 0x6a0   :  { %v793_v49 = vmul.f32 0.70710677, %v783_v46  ;;  %v775_v50 = vadd.f32 %v1294_v27, %v774_v48  ;;  %1569 = verf.f32 %v790_v45  ;;  %v789_v61 = vmul.f32 0.5, %v783_v46 }
 0x6a2   :  { %1571 = verf.f32 %v793_v49  ;;  %v791_v51 = vmul.f32 0.70710677, %v775_v50  ;;  %v787_v7 = vmul.f32 0.5, %v775_v50  ;;  %v1300_v49 = vld [vmem:[%s2018_s2 + $0xa] ss:$0 sm:$0xff] }
 0x6a4   :  { %1573 = verf.f32 %v791_v51 }
 0x6ab   :  { %v1568_v53 = vpop.eup %1567 }
 0x6ac   :  { %v800_v55 = vadd.f32 1.0, %v1568_v53 }
 0x6ad   :  { %v1570_v57 = vpop.eup %1569 }
 0x6ae   :  { %v1882_v58 = vmul.f32 %v800_v55, %v788_v54  ;;  %v798_v63 = vadd.f32 1.0, %v1570_v57 }
 0x6af   :  { %v1572_v59 = vpop.eup %1571 }
 0x6b0   :  { %v801_v62 = vadd.f32 1.0, %v1572_v59  ;;  %810 = vadd.xlane.f32.xlu1 %v1882_v58  ;;  %v816_v1 = vmul.f32 %v1882_v58, %v1882_v58  ;;  %v1890_v4 = vmul.f32 %v798_v63, %v786_v3 }
 0x6b1   :  { %v1574_v2 = vpop.eup %1573 }
 0x6b2   :  { %v1885_v0 = vmul.f32 %v801_v62, %v789_v61  ;;  %v799_v5 = vadd.f32 1.0, %v1574_v2  ;;  %v814_v9 = vmul.f32 %v1890_v4, %v1890_v4 }
 0x6b4   :  { %822 = vadd.xlane.f32.xlu1 %v816_v1  ;;  %812 = vadd.xlane.f32.xlu0 %v1885_v0  ;;  %v817_v6 = vmul.f32 %v1885_v0, %v1885_v0  ;;  %v1895_v8 = vmul.f32 %v799_v5, %v787_v7  ;;  %v1525_v7 = vld [vmem:[%s2022_s6 + $0x78] sm:$0xff]  }
 0x6b6   :  { %v815_v10 = vmul.f32 %v1895_v8, %v1895_v8 }
 0x6b8   :  { %824 = vadd.xlane.f32.xlu0 %v817_v6  ;;  %806 = vadd.xlane.f32.xlu1 %v1890_v4 }
 0x6bc   :  { %808 = vadd.xlane.f32.xlu0 %v1895_v8  ;;  %818 = vadd.xlane.f32.xlu1 %v814_v9  ;;  %v1524_v9 = vld [vmem:[%s2020_s4 + $0x18] sm:$0xff]  }
 0x6c0   :  { %820 = vadd.xlane.f32.xlu0 %v815_v10  ;;  %v1526_v10 = vld [vmem:[%s2022_s6 + $0x70] sm:$0xff]  }
 0x739   :  { %v811_v12 = vpop.xlane.xlu1 %810 }
 0x73a   :  { %v828_v13 = vmul.f32 0.0078125, %v811_v12  ;;  %v1528_v12 = vld [vmem:[%s2022_s6 + $0x60] sm:$0xff]  }
 0x73c   :  { %v836_v16 = vmul.f32 %v828_v13, %v828_v13  ;;  %v844_v40 = vsub.f32 %v1882_v58, %v828_v13  ;;  %v1529_v13 = vld [vmem:[%s2022_s6 + $0x58] sm:$0xff]  }
 0x73d   :  { %v823_v14 = vpop.xlane.xlu1 %822  ;;  %v813_v15 = vpop.xlane.xlu0 %812 }
 0x73e   :  { %v832_v17 = vmul.f32 0.0078125, %v823_v14  ;;  %v829_v18 = vmul.f32 0.0078125, %v813_v15  ;;  %v1530_v14 = vld [vmem:[%s2022_s6 + $0x50] sm:$0xff]   ;;  %v1531_v15 = vld [vmem:[%s2022_s6 + $0x48] sm:$0xff]  }
 0x740   :  { %v840_v19 = vsub.f32 %v832_v17, %v836_v16  ;;  %v837_v26 = vmul.f32 %v829_v18, %v829_v18  ;;  %v845_v44 = vsub.f32 %v1885_v0, %v829_v18  ;;  %v1532_v16 = vld [vmem:[%s2022_s6 + $0x40] sm:$0xff]  }
 0x741   :  { %v825_v21 = vpop.xlane.xlu0 %824  ;;  %v807_v23 = vpop.xlane.xlu1 %806 }
 0x742   :  { %v848_v25 = vadd.f32 1e-05, %v840_v19  ;;  %v833_v28 = vmul.f32 0.0078125, %v825_v21  ;;  %v826_v29 = vmul.f32 0.0078125, %v807_v23  ;;  %v1305_v19 = vld [vmem:[%s2021_s5 + $0x20] sm:$0xff]  ;;  %v1308_v21 = vld [vmem:[%s2021_s5 + $0x38] sm:$0xff] }
 0x743   :  { %v1307_v23 = vld [vmem:[%s2021_s5 + $0x30] sm:$0xff] }
 0x744   :  { %1575 = vrsqrt.f32 %v848_v25  ;;  %v841_v30 = vsub.f32 %v833_v28, %v837_v26  ;;  %v834_v32 = vmul.f32 %v826_v29, %v826_v29  ;;  %v842_v50 = vsub.f32 %v1890_v4, %v826_v29  ;;  %v1306_v26 = vld [vmem:[%s2021_s5 + $0x28] sm:$0xff] }
 0x745   :  { %v809_v52 = vpop.xlane.xlu0 %808  ;;  %v819_v56 = vpop.xlane.xlu1 %818 }
 0x746   :  { %v849_v47 = vadd.f32 1e-05, %v841_v30  ;;  %v827_v33 = vmul.f32 0.0078125, %v809_v52  ;;  %v830_v35 = vmul.f32 0.0078125, %v819_v56 }
 0x748   :  { %1577 = vrsqrt.f32 %v849_v47  ;;  %v838_v36 = vsub.f32 %v830_v35, %v834_v32  ;;  %v835_v24 = vmul.f32 %v827_v33, %v827_v33  ;;  %v843_v59 = vsub.f32 %v1895_v8, %v827_v33 }
 0x749   :  { %v821_v22 = vpop.xlane.xlu0 %820 }
 0x74a   :  { %v846_v37 = vadd.f32 1e-05, %v838_v36  ;;  %v831_v38 = vmul.f32 0.0078125, %v821_v22 }
 0x74c   :  { %1579 = vrsqrt.f32 %v846_v37  ;;  %v839_v27 = vsub.f32 %v831_v38, %v835_v24  ;;  %v1337_v24 = vld [vmem:[%s2018_s2 + $0xb] ss:$0 sm:$0xff] }
 0x74e   :  { %v847_v39 = vadd.f32 1e-05, %v839_v27 }
 0x750   :  { %1581 = vrsqrt.f32 %v847_v39 }
 0x751   :  { %v1576_v41 = vpop.eup %1575 }
 0x752   :  { %v856_v42 = vmul.f32 %v1576_v41, %v844_v40 }
 0x754   :  { %v864_v48 = vmul.f32 %v1299_v43, %v856_v42 }
 0x755   :  { %v1578_v45 = vpop.eup %1577 }
 0x756   :  { %v857_v46 = vmul.f32 %v1578_v45, %v845_v44  ;;  %v872_v54 = vadd.f32 %v1300_v49, %v864_v48 }
 0x758   :  { %v865_v51 = vmul.f32 %v1299_v43, %v857_v46 }
 0x759   :  { %v1580_v53 = vpop.eup %1579 }
 0x75a   :  { %v873_v55 = vadd.f32 %v1300_v49, %v865_v51  ;;  %v854_v57 = vmul.f32 %v1580_v53, %v842_v50 }
 0x75c   :  { %v880_v61 = vpack.c.bf16 %v873_v55, %v872_v54  ;;  %v862_v1 = vmul.f32 %v1299_v43, %v854_v57  ;;  %v1533_v54 = vld [vmem:[%s2023_s7 + $0x8] sm:$0xff]   ;;  %v1534_v55 = vld [vmem:[%s2023_s7] sm:$0xff]  }
 0x75d   :  { %v1582_v62 = vpop.eup %1581  ;;  %1486 = vmatprep.subr.bf16.mxu1 %v1533_v54 }
 0x75e   :  { %1458 = vmatprep.subr.bf16.mxu0 %v880_v61  ;;  %v855_v63 = vmul.f32 %v1582_v62, %v843_v59  ;;  %v870_v3 = vadd.f32 %v1300_v49, %v862_v1  ;;  %1487 = vmatpush3.bf16.msra.mxu1 %v1533_v54 }
 0x75f   :  { %1459 = vmatpush3.bf16.msra.mxu0 %v880_v61  ;;  %1488 = vmatprep.subr.bf16.mxu1 %v1534_v55 }
 0x760   :  { %v863_v2 = vmul.f32 %v1299_v43, %v855_v63 }
 0x762   :  { %v871_v5 = vadd.f32 %v1300_v49, %v863_v2  ;;  %1489 = vmatpush3.bf16.msra.mxu1 %v1534_v55 }
 0x764   :  { %v879_v6 = vpack.c.bf16 %v871_v5, %v870_v3 }
 0x766   :  { %1460 = vmatprep.subr.bf16.mxu0 %v879_v6 }
 0x767   :  { %1461 = vmatpush3.bf16.msra.mxu0 %v879_v6 }
 0x768   :  { %1466 = vmatprep.subr.bf16.mxu0 %v1525_v7 }
 0x76a   :  { %1463 = vmatmul.mubr.msk.bf16.vlgmr.msra.gmra.mxu0 %vm178_vm6, %v1524_v9 }
 0x76b   :  { %1467 = vmatpush3.bf16.msra.mxu0 %v1525_v7 }
 0x76c   :  { %1468 = vmatprep.subr.bf16.mxu0 %v1526_v10 }
 0x76f   :  { %1469 = vmatpush3.bf16.msra.mxu0 %v1526_v10 }
 0x770   :  { %1470 = vmatprep.subr.bf16.mxu0 %v1527_v11 }
 0x773   :  { %1471 = vmatpush3.bf16.msra.mxu0 %v1527_v11 }
 0x774   :  { %1472 = vmatprep.subr.bf16.mxu0 %v1528_v12 }
 0x777   :  { %1473 = vmatpush3.bf16.msra.mxu0 %v1528_v12 }
 0x778   :  { %1474 = vmatprep.subr.bf16.mxu0 %v1529_v13 }
 0x77b   :  { %1475 = vmatpush3.bf16.msra.mxu0 %v1529_v13 }
 0x77c   :  { %1476 = vmatprep.subr.bf16.mxu0 %v1530_v14 }
 0x77f   :  { %1477 = vmatpush3.bf16.msra.mxu0 %v1530_v14 }
 0x780   :  { %1478 = vmatprep.subr.bf16.mxu0 %v1531_v15 }
 0x783   :  { %1479 = vmatpush3.bf16.msra.mxu0 %v1531_v15 }
 0x784   :  { %1480 = vmatprep.subr.bf16.mxu0 %v1532_v16 }
 0x787   :  { %1481 = vmatpush3.bf16.msra.mxu0 %v1532_v16 }
 0x82a   :  { %v1464_v17 = vpop.f32.mrf.mxu0 }
 0x82b   :  { %v945_v30 = vadd.f32 %v1464_v17, %v1307_v23 }
 0x82c   :  { %v936_v18 = vpop.f32.mrf.mxu0 }
 0x82d   :  { %v937_v28 = vadd.f32 %v1305_v19, %v936_v18  ;;  %v953_v35 = vmul.f32 %v945_v30, %v1882_v58 }
 0x82e   :  { %v1465_v25 = vpop.f32.mrf.mxu0 }
 0x82f   :  { %v948_v29 = vadd.f32 %v1465_v25, %v1308_v21  ;;  %v951_v32 = vmul.f32 %v937_v28, %v1890_v4 }
 0x830   :  { %v939_v52 = vpop.f32.mrf.mxu0 }
 0x831   :  { %v940_v56 = vadd.f32 %v1306_v26, %v939_v52  ;;  %v954_v47 = vmul.f32 %v948_v29, %v1885_v0 }
 0x833   :  { %v952_v33 = vmul.f32 %v940_v56, %v1895_v8  ;;  %v956_v22 = vpack.c.bf16 %v954_v47, %v953_v35 }
 0x835   :  { %v955_v36 = vpack.c.bf16 %v952_v33, %v951_v32  ;;  %v1338_v32 = vld [vmem:[%s2018_s2 + $0xc] ss:$0 sm:$0xff] }
 0x837   :  { %1482 = vmatprep.mubr.bf16.mxu0 %v955_v36 }
 0x838   :  { %1483 = vmatmul.mubr.bf16.vlgmr.msra.gmra.mxu0 %v956_v22 }
 0x8f8   :  { %v1484_v37 = vpop.f32.mrf.mxu0 }
 0x8f9   :  { %v1073_v38 = vadd.f32 %v1484_v37, %v1830_v31 }
 0x8fa   :  { %v1056_v27 = vpop.f32.mrf.mxu0 }
 0x8fb   :  { %v1964_v39 = vadd.f32 %v1337_v24, %v1073_v38  ;;  %v1071_v0 = vadd.f32 %v1056_v27, %v1833_v60  ;;  %v1339_v27 = vld [vmem:[%s2018_s2 + $0xd] ss:$0 sm:$0xff]  ;;  %s1243_s2 = sshll.u32 %s1615_s22, 4  ;;  %s1244_s2 = int_to_ptr.vmem [resolvable:$true] %s1243_s2 }
 0x8fc   :  { %v1485_v4 = vpop.f32.mrf.mxu0  ;;  %s1591_s23 = scalar_lea.vmem %s1244_s2, 512  ;;  %p1596_p1 = scmp.lt.s32.totalorder %s1244_s2, %s1244_s2 }
 0x8fd   :  { %v1967_v8 = vadd.f32 %v1337_v24, %v1071_v0  ;;  %v1074_v58 = vadd.f32 %v1485_v4, %v1838_v34  ;;  %v1091_v40 = vsel %vm178_vm6, %v1964_v39, 0.0  ;;  %p1592_p0 = scmp.ne.s32.totalorder %s1244_s2, %s1591_s23  ;;  %p1597_p2 = scmp.lt.s32.totalorder %s1591_s23, %s1591_s23 }
 0x8fe   :  { %1092 = vadd.xlane.f32.xlu1 %v1091_v40  ;;  %v1059_v41 = vpop.f32.mrf.mxu0 }
 0x8ff   :  { %v1972_v42 = vadd.f32 %v1337_v24, %v1074_v58  ;;  %v1072_v43 = vadd.f32 %v1059_v41, %v1841_v20  ;;  %v1085_v44 = vsel %vm178_vm6, %v1967_v8, 0.0  ;;  %v1097_v34 = vmul.f32 %v1967_v8, %v1967_v8  ;;  %p1598_p3 = por %p1597_p2, %p1596_p1 }
 0x900   :  { %v1099_v20 = vmul.f32 %v1964_v39, %v1964_v39 }
 0x901   :  { %v1975_v31 = vadd.f32 %v1337_v24, %v1072_v43  ;;  %v1094_v60 = vsel %vm178_vm6, %v1972_v42, 0.0  ;;  %v1101_v45 = vsel %vm178_vm6, %v1097_v34, 0.0  ;;  %v1100_v51 = vmul.f32 %v1972_v42, %v1972_v42  ;;  %p1599_p4 = pnand %p1598_p3, %p1592_p0 }
 0x902   :  { %1086 = vadd.xlane.f32.xlu1 %v1085_v44  ;;  %1095 = vadd.xlane.f32.xlu0 %v1094_v60  ;;  %v1107_v49 = vsel %vm178_vm6, %v1099_v20, 0.0 }
 0x903   :  { %v1088_v46 = vsel %vm178_vm6, %v1975_v31, 0.0  ;;  %v1098_v48 = vmul.f32 %v1975_v31, %v1975_v31  ;;  %v1110_v53 = vsel %vm178_vm6, %v1100_v51, 0.0 }
 0x905   :  { %v1104_v50 = vsel %vm178_vm6, %v1098_v48, 0.0 }
 0x906   :  { %1102 = vadd.xlane.f32.xlu1 %v1101_v45  ;;  %1089 = vadd.xlane.f32.xlu0 %v1088_v46 }
 0x90a   :  { %1108 = vadd.xlane.f32.xlu1 %v1107_v49  ;;  %1105 = vadd.xlane.f32.xlu0 %v1104_v50 }
 0x90e   :  { %1111 = vadd.xlane.f32.xlu0 %v1110_v53 }
 0x987   :  { %v1093_v57 = vpop.xlane.xlu1 %1092 }
 0x988   :  { %v1115_v63 = vmul.f32 0.03125, %v1093_v57 }
 0x98a   :  { %v1123_v9 = vmul.f32 %v1115_v63, %v1115_v63  ;;  %v1131_v47 = vsub.f32 %v1964_v39, %v1115_v63 }
 0x98b   :  { %v1087_v59 = vpop.xlane.xlu1 %1086  ;;  %v1096_v61 = vpop.xlane.xlu0 %1095 }
 0x98c   :  { %v1113_v62 = vmul.f32 0.03125, %v1087_v59  ;;  %v1116_v10 = vmul.f32 0.03125, %v1096_v61 }
 0x98e   :  { %v1121_v3 = vmul.f32 %v1113_v62, %v1113_v62  ;;  %v1124_v21 = vmul.f32 %v1116_v10, %v1116_v10  ;;  %v1129_v52 = vsub.f32 %v1967_v8, %v1113_v62  ;;  %v1132_v38 = vsub.f32 %v1972_v42, %v1116_v10 }
 0x98f   :  { %v1103_v1 = vpop.xlane.xlu1 %1102  ;;  %v1090_v2 = vpop.xlane.xlu0 %1089 }
 0x990   :  { %v1117_v5 = vmul.f32 0.03125, %v1103_v1  ;;  %v1114_v6 = vmul.f32 0.03125, %v1090_v2 }
 0x992   :  { %v1125_v7 = vsub.f32 %v1117_v5, %v1121_v3  ;;  %v1122_v14 = vmul.f32 %v1114_v6, %v1114_v6  ;;  %v1130_v35 = vsub.f32 %v1975_v31, %v1114_v6 }
 0x993   :  { %v1109_v11 = vpop.xlane.xlu1 %1108  ;;  %v1106_v12 = vpop.xlane.xlu0 %1105 }
 0x994   :  { %v1133_v13 = vadd.f32 1e-05, %v1125_v7  ;;  %v1119_v15 = vmul.f32 0.03125, %v1109_v11  ;;  %v1118_v16 = vmul.f32 0.03125, %v1106_v12 }
 0x996   :  { %1583 = vrsqrt.f32 %v1133_v13  ;;  %v1127_v17 = vsub.f32 %v1119_v15, %v1123_v9  ;;  %v1126_v18 = vsub.f32 %v1118_v16, %v1122_v14 }
 0x997   :  { %v1112_v19 = vpop.xlane.xlu0 %1111 }
 0x998   :  { %v1135_v23 = vadd.f32 1e-05, %v1127_v17  ;;  %v1134_v25 = vadd.f32 1e-05, %v1126_v18  ;;  %v1120_v26 = vmul.f32 0.03125, %v1112_v19 }
 0x99a   :  { %1585 = vrsqrt.f32 %v1135_v23  ;;  %v1128_v28 = vsub.f32 %v1120_v26, %v1124_v21 }
 0x99b   :  { %1587 = vrsqrt.f32 %v1134_v25 }
 0x99c   :  { %v1136_v29 = vadd.f32 1e-05, %v1128_v28 }
 0x99e   :  { %1589 = vrsqrt.f32 %v1136_v29 }
 0x9a3   :  { %v1584_v30 = vpop.eup %1583 }
 0x9a4   :  { %v1141_v56 = vmul.f32 %v1584_v30, %v1129_v52 }
 0x9a6   :  { %v1149_v37 = vmul.f32 %v1338_v32, %v1141_v56 }
 0x9a7   :  { %v1586_v33 = vpop.eup %1585 }
 0x9a8   :  { %v1588_v36 = vpop.eup %1587  ;;  %v1143_v22 = vmul.f32 %v1586_v33, %v1131_v47  ;;  %v1157_v58 = vadd.f32 %v1339_v27, %v1149_v37 }
 0x9a9   :  { %v1142_v24 = vmul.f32 %v1588_v36, %v1130_v35 }
 0x9aa   :  { %v1151_v8 = vmul.f32 %v1338_v32, %v1143_v22 }
 0x9ab   :  { %v1590_v0 = vpop.eup %1589  ;;  %v1150_v4 = vmul.f32 %v1338_v32, %v1142_v24 }
 0x9ac   :  { %v1144_v39 = vmul.f32 %v1590_v0, %v1132_v38  ;;  %v1159_v44 = vadd.f32 %v1339_v27, %v1151_v8 }
 0x9ad   :  { %v1158_v40 = vadd.f32 %v1339_v27, %v1150_v4 }
 0x9ae   :  { %v1152_v41 = vmul.f32 %v1338_v32, %v1144_v39 }
 0x9af   :  { %v1161_v43 = vpack.c.bf16 %v1158_v40, %v1157_v58 }
 0x9b0   :  { %v1160_v31 = vadd.f32 %v1339_v27, %v1152_v41 }
 0x9b1   :  { %1490 = vmatprep.mubr.msk.bf16.mxu1 %vm178_vm6, %v1161_v43 }
 0x9b2   :  { %v1162_v60 = vpack.c.bf16 %v1160_v31, %v1159_v44 }
 0x9b4   :  { %1491 = vmatmul.mubr.msk.bf16.vlgmr.msra.gmra.mxu1 %vm178_vm6, %v1162_v60 }
 0xa74   :  { %v1492_v42 = vpop.f32.mrf.mxu1 }
 0xa75   :  { %1236 = vst [vmem:[#allocation2 + $0x10] sm:$0xff] %v1492_v42 }
 0xa76   :  { %v1219_v34 = vpop.f32.mrf.mxu1 }
 0xa77   :  { %1234 = vst [vmem:[#allocation2] sm:$0xff] %v1219_v34 }
 0xa78   :  { %v1493_v45 = vpop.f32.mrf.mxu1 }
 0xa79   :  { %1237 = vst [vmem:[#allocation2 + $0x18] sm:$0xff] %v1493_v45 }
 0xa7a   :  { %v1222_v46 = vpop.f32.mrf.mxu1 }
 0xa7b   :  { %1235 = vst [vmem:[#allocation2 + $0x8] sm:$0xff] %v1222_v46 }
 0xa7c   :  { %1602 = shalt.err (!%p1599_p4)
}
 0xa7d   :  { %s1616_s24 = smov 128   ;;  %s1617_s4 = smov 8  }
 0xa7e   :  { %1249 = dma.vmem_to_hbm [thread:$0]  %s1244_s2, 512, %s2024_s8, [#allocation3], %s1616_s24, %s1616_s24, %s1617_s4  }
 0xa7f   :  { %1611 = dma.done.wait [#allocation3], 512  }
 0xa80   :  { %1612 = vsyncadd [#allocation3], 4294966784 }
 0xa81   :  { %1253 = vsyncpa [#allocation3], 1 }

</bundles_post_ra>
